<compile_context>
chip_gen: v7x
topology: tpu7x:2x2x1
jax: 0.10.0
libtpu: 0.0.40
codegen_flags: <defaults>
</compile_context>

<pallas_src>
import jax
import jax.numpy as jnp
from jax.experimental import pallas as pl
from jax.experimental.pallas import tpu as pltpu

_LANE = 128


def _vdn_sum_kernel(q_ref, out_ref):
    """Reduce one lane-dense tile over the full agent axis.

    q_ref:   (n_agents, TILE) input tile
    out_ref: (1, TILE)        output tile
    """
    acc = jnp.sum(q_ref[...].astype(jnp.float32), axis=0, keepdims=True)
    out_ref[...] = acc.astype(out_ref.dtype)


def vdn_mixer(agent_qs: jax.Array) -> jax.Array:
    """Pallas equivalent of VDNMixer.forward: sum over dim 0, keepdim=True."""
    n_agents, batch, qdim = agent_qs.shape
    m = batch * qdim

    # Flatten trailing dims to one lane-dense axis.
    x = agent_qs.reshape(n_agents, m)

    dtype_bytes = jnp.dtype(agent_qs.dtype).itemsize
    # Target roughly 2 MiB per input block (double-buffered by Pallas), so the
    # working set stays far below even v7x's 64 MiB VMEM while DMAs stay big.
    max_tile = max(_LANE, (2 * 1024 * 1024) // max(1, n_agents * dtype_bytes))
    max_tile = (max_tile // _LANE) * _LANE

    # Pad the flattened axis to a multiple of 128 lanes, then to a multiple of
    # the tile so every block is full (unmasked loads/stores, no partial DMA).
    m_pad = ((m + _LANE - 1) // _LANE) * _LANE
    tile = min(max_tile, m_pad)
    m_pad = ((m_pad + tile - 1) // tile) * tile
    if m_pad != m:
        x = jnp.pad(x, ((0, 0), (0, m_pad - m)))

    grid = (m_pad // tile,)

    out = pl.pallas_call(
        _vdn_sum_kernel,
        out_shape=jax.ShapeDtypeStruct((1, m_pad), agent_qs.dtype),
        grid_spec=pl.GridSpec(
            grid=grid,
            in_specs=[
                # Whole agent axis per block; tile the flattened B*Q axis.
                pl.BlockSpec((n_agents, tile), lambda j: (0, j)),
            ],
            out_specs=pl.BlockSpec((1, tile), lambda j: (0, j)),
        ),
        compiler_params=pltpu.CompilerParams(
            # Tiles along the flattened axis are independent -> parallel
            # (lets v7x split them across its two TensorCores).
            dimension_semantics=("parallel",),
        ),
    )(x)

    return out[:, :m].reshape(1, batch, qdim)


if __name__ == "__main__":
    # VDNMixer has no parameters, so only the input tensor is needed.
    key = jax.random.PRNGKey(0)

    # Primary check: lane-aligned shapes.
    n_agents, batch, qdim = 4, 8, 32
    agent_qs = jax.random.normal(key, (n_agents, batch, qdim), dtype=jnp.float32)
    out = jax.block_until_ready(vdn_mixer(agent_qs))
    ref = jnp.sum(agent_qs, axis=0, keepdims=True)
    assert out.shape == (1, batch, qdim), out.shape
    assert jnp.allclose(out, ref, atol=1e-6, rtol=1e-6), "mismatch vs reference"

    # Secondary check: unaligned trailing dims exercise the padding path.
    key2 = jax.random.PRNGKey(1)
    agent_qs2 = jax.random.normal(key2, (3, 8, 5), dtype=jnp.float32)
    out2 = jax.block_until_ready(vdn_mixer(agent_qs2))
    ref2 = jnp.sum(agent_qs2, axis=0, keepdims=True)
    assert out2.shape == (1, 8, 5), out2.shape
    assert jnp.allclose(out2, ref2, atol=1e-6, rtol=1e-6), "mismatch (padded path)"

    print("KERNEL_OK")
</pallas_src>

<mosaic_0001>
module attributes {stable_mosaic.version = 11 : i64} {
  func.func @_vdn_sum_kernel(%arg0: i32, %arg1: memref<4x256xf32, #tpu.memory_space<vmem>>, %arg2: memref<1x256xf32, #tpu.memory_space<vmem>>) attributes {dimension_semantics = [#tpu.dimension_semantics<parallel>], iteration_bounds = array<i64: 1>, scalar_prefetch = 0 : i64, scratch_operands = 0 : i64, tpu.core_type = #tpu.core_type<tc>, window_params = [{transform_indices = @transform_0, window_bounds = array<i64: 4, 256>}, {transform_indices = @transform_1, window_bounds = array<i64: 1, 256>}]} {
    %c0 = arith.constant 0 : index
    %c0_0 = arith.constant 0 : index
    %0 = vector.load %arg1[%c0, %c0_0] : memref<4x256xf32, #tpu.memory_space<vmem>>, vector<4x256xf32>
    %cst = arith.constant dense<0.000000e+00> : vector<256xf32>
    %1 = vector.multi_reduction <add>, %0, %cst [0] : vector<4x256xf32> to vector<256xf32>
    %2 = vector.shape_cast %1 : vector<256xf32> to vector<1x256xf32>
    %c0_1 = arith.constant 0 : index
    %c0_2 = arith.constant 0 : index
    %3 = vector.load %arg2[%c0_1, %c0_2] : memref<1x256xf32, #tpu.memory_space<vmem>>, vector<1x256xf32>
    tpu.vector_store %arg2[%c0_1, %c0_2], %2 {strides = array<i32>} : memref<1x256xf32, #tpu.memory_space<vmem>>, vector<1x256xf32>,
    return
  }
  func.func @transform_0(%arg0: i32) -> (i32, i32) {
    %c0_i32 = arith.constant 0 : i32
    %c0_i32_0 = arith.constant 0 : i32
    return %c0_i32, %arg0 : i32, i32
  }
  func.func @transform_1(%arg0: i32) -> (i32, i32) {
    %c0_i32 = arith.constant 0 : i32
    %c0_i32_0 = arith.constant 0 : i32
    return %c0_i32, %arg0 : i32, i32
  }
}

</mosaic_0001>

<bundles_post_ra>
// kernel: tpu_custom_call.1
= control target key start
LH: loop header
LB: loop body
LE: loop exit
PB: predicated region body
PF: predicated region fallthrough
CT: control target
= control target key end

     0   :  { %6 = vsyncpa [#allocation3], 0  ;;  %s167_s0 = inlined_call_operand.hbm [shape: f32[4,256], index: 0, kind: input, shape index: {}]   ;;  %s168_s1 = inlined_call_operand.hbm [shape: f32[1,256], index: 1, kind: output, shape index: {}]  }
   0x1   :  { %7 = vsyncpa [#allocation4], 0  ;;  %s130_s6 = smov [#allocation2]   ;;  %s82_s10 = scalar_lea.hbm %s167_s0, 128 }
   0x2   :  { %s14_s7 = sshll.u32 %s130_s6, 4  ;;  %p83_p0 = scmp.ne.s32.totalorder %s167_s0, %s82_s10  ;;  %s15_s7 = int_to_ptr.vmem [resolvable:$true] %s14_s7 }
   0x3   :  { %p86_p1 = scmp.lt.u32.totalorder %s82_s10, %s167_s0 }
   0x5   :  { %p88_p2 = pnand %p86_p1, %p83_p0 }
   0x7   :  { %91 = shalt.err (!%p88_p2)
}
   0x8   :  { %s92_s15 = scalar_lea.vmem %s15_s7, 128  ;;  %p97_p4 = scmp.lt.s32.totalorder %s15_s7, %s15_s7 }
   0x9   :  { %p93_p3 = scmp.ne.s32.totalorder %s15_s7, %s92_s15  ;;  %p98_p5 = scmp.lt.s32.totalorder %s92_s15, %s92_s15 }
   0xb   :  { %p99_p6 = por %p98_p5, %p97_p4 }
   0xd   :  { %p100_p7 = pnand %p99_p6, %p93_p3 }
   0xf   :  { %103 = shalt.err (!%p100_p7)
}
  0x10   :  { %17 = dma.hbm_to_vmem [thread:$0]  %s167_s0, 128, %s15_s7, [#allocation3]  }
  0x11   :  { %126 = dma.done.wait [#allocation3], 128  }
  0x12   :  { %127 = vsyncadd [#allocation3], 4294967168  ;;  %vm25_vm0 = vcmask 1043456   ;;  %v21_v0 = vld [vmem:[#allocation2] sm:$0xff]  ;;  %v131_v9 = vmov 1966171168   ;;  %v46_v11 = vlaneseq }
  0x13   :  { %v23_v1 = vcombine.high %v21_v0, %v21_v0  ;;  %v26_v2 = vsel %vm25_vm0, %v21_v0, 0.0  ;;  %v44_v10 = vunpack.c.l.s4 %v131_v9  ;;  %s132_s0 = smov [#allocation5]  }
  0x14   :  { %v27_v3 = vrot.slane %v26_v2, 4  ;;  %v47_v17 = vshrl.u32 %v46_v11, 7  ;;  %s69_s18 = sshll.u32 %s132_s0, 4  ;;  %vm60_vm1 = vcmp.lt.s32.totalorder %v46_v11, 256  ;;  %s70_s18 = int_to_ptr.vmem [resolvable:$true] %s69_s18 }
  0x15   :  { %v33_v4 = vsel %vm25_vm0, %v23_v1, 0.0  ;;  %v45_v16 = vunpack.c.0.s8 %v44_v10  ;;  %s104_s19 = scalar_lea.vmem %s70_s18, 32  ;;  %p109_p9 = scmp.lt.s32.totalorder %s70_s18, %s70_s18 }
  0x16   :  { %v28_v5 = vadd.f32 %v27_v3, %v26_v2  ;;  %v34_v6 = vrot.slane %v33_v4, 4  ;;  %p105_p8 = scmp.ne.s32.totalorder %s70_s18, %s104_s19  ;;  %p110_p10 = scmp.lt.s32.totalorder %s104_s19, %s104_s19 }
  0x17   :  { %v48_v21 = vsub.s32 %v45_v16, %v47_v17 }
  0x18   :  { %v29_v7 = vrot.slane %v28_v5, 2  ;;  %v35_v8 = vadd.f32 %v34_v6, %v33_v4  ;;  %p111_p11 = por %p110_p10, %p109_p9 }
  0x1a   :  { %v30_v12 = vadd.f32 %v29_v7, %v28_v5  ;;  %v36_v13 = vrot.slane %v35_v8, 2  ;;  %p112_p12 = pnand %p111_p11, %p105_p8 }
  0x1c   :  { %v31_v14 = vrot.slane %v30_v12, 1  ;;  %v37_v15 = vadd.f32 %v36_v13, %v35_v8 }
  0x1e   :  { %v32_v18 = vadd.f32 %v31_v14, %v30_v12  ;;  %v38_v19 = vrot.slane %v37_v15, 1 }
  0x20   :  { %v39_v20 = vadd.f32 %v38_v19, %v37_v15 }
  0x22   :  { %v42_v22 = vcombine.low %v32_v18, %v39_v20 }
  0x24   :  { %v49_v23 = vrot.slane %v42_v22, %v48_v21 }
  0x26   :  { %v56_v24 = vrot.slane %v49_v23, %v48_v21 }
  0x28   :  { %62 = vst.msk [vmem:[#allocation5] sm:$0x3] %vm60_vm1, %v56_v24 }
  0x29   :  { %115 = shalt.err (!%p112_p12)
}
  0x2a   :  { %s116_s22 = scalar_lea.hbm %s168_s1, 32 }
  0x2b   :  { %p117_p13 = scmp.ne.s32.totalorder %s168_s1, %s116_s22  ;;  %p120_p0 = scmp.lt.u32.totalorder %s116_s22, %s168_s1 }
  0x2d   :  { %p122_p1 = pnand %p120_p0, %p117_p13 }
  0x2f   :  { %125 = shalt.err (!%p122_p1)
}
  0x30   :  { %72 = dma.vmem_to_hbm [thread:$0]  %s70_s18, 32, %s168_s1, [#allocation4]  }
  0x31   :  { %128 = dma.done.wait [#allocation4], 32  }
  0x32   :  { %129 = vsyncadd [#allocation4], 4294967264 }
  0x33   :  { %76 = vsyncpa [#allocation3], 1 }
  0x34   :  { %77 = vsyncpa [#allocation4], 1 }

</bundles_post_ra>
